<compile_context>
chip_gen: v7x
topology: tpu7x:2x2x1
jax: 0.10.0
libtpu: 0.0.40
codegen_flags: <defaults>
</compile_context>

<pallas_src>
import functools

import jax
import jax.numpy as jnp
from jax.experimental import pallas as pl
from jax.experimental.pallas import tpu as pltpu


def _leaky_relu(x, slope):
    return jnp.where(x >= 0.0, x, slope * x)


def _elu(x):
    return jnp.where(x > 0.0, x, jnp.exp(x) - 1.0)   # ELU(alpha=1)


def _masked_softmax(logits, edge_mask, negative_slope):
    """Row-wise softmax of LeakyReLU(logits) over entries where edge_mask is True.

    Works for 2-D [N, N] or stacked 3-D [H, N, N] logits (softmax over last axis).
    """
    logits = _leaky_relu(logits, negative_slope)
    masked = jnp.where(edge_mask, logits, jnp.float32(-1e30))
    m = jnp.max(masked, axis=-1, keepdims=True)
    p = jnp.exp(masked - m)                      # non-edges underflow to exact 0.0
    denom = jnp.maximum(jnp.sum(p, axis=-1, keepdims=True), jnp.float32(1e-20))
    # Reciprocal on the EUP (otherwise idle) instead of a VPU divide.
    return p * pl.reciprocal(denom, approx=True)


def _single_head_layer(h_in, w, a_mat, bias, edge_mask, negative_slope, apply_elu):
    """GATConv with heads=1 (PyG semantics), f32 throughout, all 2-D ops, value->value."""
    xw = jnp.dot(h_in, w, preferred_element_type=jnp.float32)           # [N, C]
    al = jnp.dot(xw, a_mat, preferred_element_type=jnp.float32)         # [N, 2] (src, dst)
    # logits[i, j] = alpha_dst[i] + alpha_src[j]
    attn = _masked_softmax(al[:, 1:2] + al[:, 0:1].T, edge_mask, negative_slope)
    out = jnp.dot(attn, xw, preferred_element_type=jnp.float32) + bias
    if apply_elu:
        out = _elu(out)
    return out


def _community_gat_kernel(x_ref, adj_ref, p_ref, out_ref, *,
                          heads, hidden, layout, negative_slope=0.2):
    """Fused conv1(H heads)+ELU -> conv2(1 head)+ELU -> conv3(1 head)."""
    def param(i):
        r0, nrows, ncols = layout[i]
        return p_ref[r0:r0 + nrows, 0:ncols]        # static (tile-aligned row) slice

    w1, a1, b1, w2, a2, b2, w3, a3, b3 = (param(i) for i in range(9))

    edge_mask = adj_ref[...] > 0.0                                       # [N, N] bool

    # ---------------- layer 1: heads=H, concat=True, fused ELU ----------------
    x = x_ref[...].astype(jnp.float32)                                   # [N, Fin]
    xw1 = jnp.dot(x, w1, preferred_element_type=jnp.float32)             # [N, H*hidden]
    al1 = jnp.dot(xw1, a1, preferred_element_type=jnp.float32)           # [N, 2H]
    asrc_t = al1[:, :heads].T                                            # [H, N] (one transpose)
    adst = al1[:, heads:]                                                # [N, H]

    # Stacked logits [H, N, N]: logits[h, i, j] = alpha_dst[i, h] + alpha_src[j, h].
    logits = jnp.stack(
        [adst[:, h:h + 1] + asrc_t[h:h + 1, :] for h in range(heads)], axis=0)
    # One fused masked softmax over all heads.
    attn = _masked_softmax(logits, edge_mask[None, :, :], negative_slope)  # [H, N, N]

    # Per-head aggregation (4 small MXU matmuls), combined once in registers.
    head_outs = [
        jnp.dot(attn[h], xw1[:, h * hidden:(h + 1) * hidden],
                preferred_element_type=jnp.float32)
        for h in range(heads)
    ]
    h1 = jnp.concatenate(head_outs, axis=-1) + b1                        # [N, H*hidden]
    h1 = _elu(h1)                         # dropout(p=0.3) = identity in eval mode

    # ---------------- layer 2: heads=1, fused ELU ----------------
    h2 = _single_head_layer(h1, w2, a2, b2, edge_mask, negative_slope, apply_elu=True)

    # ---------------- layer 3: heads=1, no activation ----------------
    h3 = _single_head_layer(h2, w3, a3, b3, edge_mask, negative_slope, apply_elu=False)
    out_ref[...] = h3.astype(out_ref.dtype)


def pack_gat_params(params):
    """Pack all nine 2-D parameter arrays into one f32 slab.

    Each block starts on an 8-row (sublane) boundary and is zero-padded on the
    column axis to the common max width, so in-kernel static slices are cheap.
    Returns (slab, layout) with layout = ((row_start, nrows, ncols), ...) in the
    fixed order w1,a1,b1,w2,a2,b2,w3,a3,b3.
    """
    arrays = []
    for layer in ("l1", "l2", "l3"):
        p = params[layer]
        arrays += [p["w"], p["a_mat"], p["bias"]]
    max_cols = max(int(a.shape[1]) for a in arrays)
    blocks, layout, row = [], [], 0
    for a in arrays:
        r, c = int(a.shape[0]), int(a.shape[1])
        layout.append((row, r, c))
        pad_r = (-r) % 8
        blocks.append(jnp.pad(a.astype(jnp.float32),
                              ((0, pad_r), (0, max_cols - c))))
        row += r + pad_r
    slab = jnp.concatenate(blocks, axis=0)
    return slab, tuple(layout)


def community_gat_forward(x, adj, param_slab, layout, *, hidden, emb, heads):
    """One pallas_call for the whole 3-layer network (3 inputs, 1 output, no scratch)."""
    n = x.shape[0]
    kernel = functools.partial(_community_gat_kernel,
                               heads=heads, hidden=hidden, layout=layout)
    vmem = pl.BlockSpec(memory_space=pltpu.MemorySpace.VMEM)
    return pl.pallas_call(
        kernel,
        out_shape=jax.ShapeDtypeStruct((n, emb), jnp.float32),
        in_specs=[vmem, vmem, vmem],
        out_specs=vmem,
    )(x, adj, param_slab)


def init_gat_params(key, in_channels, out_channels, heads):
    """Deterministic (synthetic) GATConv parameters with pre-fused attention matrix."""
    k_w, k_as, k_ad = jax.random.split(key, 3)
    scale = 1.0 / jnp.sqrt(jnp.float32(in_channels))
    w = jax.random.normal(k_w, (in_channels, heads * out_channels), jnp.float32) * scale
    a_src = jax.random.normal(k_as, (heads, out_channels), jnp.float32) * 0.1
    a_dst = jax.random.normal(k_ad, (heads, out_channels), jnp.float32) * 0.1
    # Fused block-diagonal attention projection [H*C, 2H]:
    #   cols 0..H-1  -> per-head src scalars, cols H..2H-1 -> per-head dst scalars.
    hc = heads * out_channels
    a_mat = jnp.zeros((hc, 2 * heads), jnp.float32)
    for h in range(heads):
        a_mat = a_mat.at[h * out_channels:(h + 1) * out_channels, h].set(a_src[h])
        a_mat = a_mat.at[h * out_channels:(h + 1) * out_channels, heads + h].set(a_dst[h])
    bias = jnp.zeros((1, hc), jnp.float32)
    return dict(w=w, a_mat=a_mat, bias=bias)


if __name__ == "__main__":
    key = jax.random.PRNGKey(0)
    k_x, k_l1, k_l2, k_l3 = jax.random.split(key, 4)

    # Small synthetic graph / model config.
    N = 16            # number of nodes (congress members)
    IN_CH = 4         # input node features
    HIDDEN = 8        # hidden channels
    EMB = 16          # embedding dim
    HEADS = 4         # attention heads in conv1

    # Node features.
    x = jax.random.normal(k_x, (N, IN_CH), jnp.float32)

    # Deterministic edge_index: ring (both directions) + a few chords.
    src, dst = [], []
    for i in range(N):
        src += [i, (i + 1) % N]
        dst += [(i + 1) % N, i]
    for i in range(0, N, 4):
        src += [i, (i + 5) % N]
        dst += [(i + 5) % N, i]
    edge_index = jnp.array([src, dst], dtype=jnp.int32)   # [2, E]

    # Dense adjacency mask with self-loops: adj[dst, src] = 1.
    adj = jnp.zeros((N, N), jnp.float32)
    adj = adj.at[edge_index[1], edge_index[0]].set(1.0)
    adj = adj.at[jnp.arange(N), jnp.arange(N)].set(1.0)

    params = {
        "l1": init_gat_params(k_l1, IN_CH, HIDDEN, HEADS),
        "l2": init_gat_params(k_l2, HIDDEN * HEADS, HIDDEN, 1),
        "l3": init_gat_params(k_l3, HIDDEN, EMB, 1),
    }
    param_slab, layout = pack_gat_params(params)

    out = community_gat_forward(x, adj, param_slab, layout,
                                hidden=HIDDEN, emb=EMB, heads=HEADS)
    out = jax.block_until_ready(out)
    assert out.shape == (N, EMB), out.shape
    assert bool(jnp.all(jnp.isfinite(out)))
    print("KERNEL_OK")
</pallas_src>

<mosaic_0001>
module attributes {stable_mosaic.version = 11 : i64} {
  func.func @_community_gat_kernel(%arg0: memref<16x4xf32, #tpu.memory_space<vmem>>, %arg1: memref<16x16xf32, #tpu.memory_space<vmem>>, %arg2: memref<128x32xf32, #tpu.memory_space<vmem>>, %arg3: memref<16x16xf32, #tpu.memory_space<vmem>>) attributes {dimension_semantics = [], scalar_prefetch = 0 : i64, scratch_operands = 0 : i64, tpu.core_type = #tpu.core_type<tc>} {
    %c0 = arith.constant 0 : index
    %c0_0 = arith.constant 0 : index
    %0 = vector.load %arg2[%c0, %c0_0] : memref<128x32xf32, #tpu.memory_space<vmem>>, vector<4x32xf32>
    %c8 = arith.constant 8 : index
    %c0_1 = arith.constant 0 : index
    %1 = vector.load %arg2[%c8, %c0_1] : memref<128x32xf32, #tpu.memory_space<vmem>>, vector<32x8xf32>
    %c40 = arith.constant 40 : index
    %c0_2 = arith.constant 0 : index
    %2 = vector.load %arg2[%c40, %c0_2] : memref<128x32xf32, #tpu.memory_space<vmem>>, vector<1x32xf32>
    %c48 = arith.constant 48 : index
    %c0_3 = arith.constant 0 : index
    %3 = vector.load %arg2[%c48, %c0_3] : memref<128x32xf32, #tpu.memory_space<vmem>>, vector<32x8xf32>
    %c80 = arith.constant 80 : index
    %c0_4 = arith.constant 0 : index
    %4 = vector.load %arg2[%c80, %c0_4] : memref<128x32xf32, #tpu.memory_space<vmem>>, vector<8x2xf32>
    %c88 = arith.constant 88 : index
    %c0_5 = arith.constant 0 : index
    %5 = vector.load %arg2[%c88, %c0_5] : memref<128x32xf32, #tpu.memory_space<vmem>>, vector<1x8xf32>
    %c96 = arith.constant 96 : index
    %c0_6 = arith.constant 0 : index
    %6 = vector.load %arg2[%c96, %c0_6] : memref<128x32xf32, #tpu.memory_space<vmem>>, vector<8x16xf32>
    %c104 = arith.constant 104 : index
    %c0_7 = arith.constant 0 : index
    %7 = vector.load %arg2[%c104, %c0_7] : memref<128x32xf32, #tpu.memory_space<vmem>>, vector<16x2xf32>
    %c120 = arith.constant 120 : index
    %c0_8 = arith.constant 0 : index
    %8 = vector.load %arg2[%c120, %c0_8] : memref<128x32xf32, #tpu.memory_space<vmem>>, vector<1x16xf32>
    %c0_9 = arith.constant 0 : index
    %c0_10 = arith.constant 0 : index
    %9 = vector.load %arg1[%c0_9, %c0_10] : memref<16x16xf32, #tpu.memory_space<vmem>>, vector<16x16xf32>
    %cst = arith.constant 0.000000e+00 : f32
    %10 = vector.broadcast %cst : f32 to vector<16x16xf32>
    %11 = arith.cmpf ogt, %9, %10 : vector<16x16xf32>
    %c0_11 = arith.constant 0 : index
    %c0_12 = arith.constant 0 : index
    %12 = vector.load %arg0[%c0_11, %c0_12] : memref<16x4xf32, #tpu.memory_space<vmem>>, vector<16x4xf32>
    %cst_13 = arith.constant dense<0.000000e+00> : vector<16x32xf32>
    %13 = tpu.matmul %12, %0, %cst_13 {dimension_numbers = #tpu.dot_dimension_numbers<[1], [0], [0], [1], [0, 0, 1, 1], [], []>} : vector<16x4xf32>, vector<4x32xf32>, vector<16x32xf32> -> vector<16x32xf32>
    %cst_14 = arith.constant dense<0.000000e+00> : vector<16x8xf32>
    %14 = tpu.matmul %13, %1, %cst_14 {dimension_numbers = #tpu.dot_dimension_numbers<[1], [0], [0], [1], [0, 0, 1, 1], [], []>} : vector<16x32xf32>, vector<32x8xf32>, vector<16x8xf32> -> vector<16x8xf32>
    %15 = vector.extract_strided_slice %14 {offsets = [0, 0], sizes = [16, 4], strides = [1, 1]} : vector<16x8xf32> to vector<16x4xf32>
    %16 = tpu.transpose %15, [1, 0] : vector<16x4xf32> -> vector<4x16xf32>
    %17 = vector.extract_strided_slice %14 {offsets = [0, 4], sizes = [16, 4], strides = [1, 1]} : vector<16x8xf32> to vector<16x4xf32>
    %18 = vector.extract_strided_slice %17 {offsets = [0, 0], sizes = [16, 1], strides = [1, 1]} : vector<16x4xf32> to vector<16x1xf32>
    %19 = vector.extract_strided_slice %16 {offsets = [0, 0], sizes = [1, 16], strides = [1, 1]} : vector<4x16xf32> to vector<1x16xf32>
    %20 = vector.broadcast %18 : vector<16x1xf32> to vector<16x16xf32>
    %21 = vector.broadcast %19 : vector<1x16xf32> to vector<16x16xf32>
    %22 = arith.addf %20, %21 : vector<16x16xf32>
    %23 = vector.extract_strided_slice %17 {offsets = [0, 1], sizes = [16, 1], strides = [1, 1]} : vector<16x4xf32> to vector<16x1xf32>
    %24 = vector.extract_strided_slice %16 {offsets = [1, 0], sizes = [1, 16], strides = [1, 1]} : vector<4x16xf32> to vector<1x16xf32>
    %25 = vector.broadcast %23 : vector<16x1xf32> to vector<16x16xf32>
    %26 = vector.broadcast %24 : vector<1x16xf32> to vector<16x16xf32>
    %27 = arith.addf %25, %26 : vector<16x16xf32>
    %28 = vector.extract_strided_slice %17 {offsets = [0, 2], sizes = [16, 1], strides = [1, 1]} : vector<16x4xf32> to vector<16x1xf32>
    %29 = vector.extract_strided_slice %16 {offsets = [2, 0], sizes = [1, 16], strides = [1, 1]} : vector<4x16xf32> to vector<1x16xf32>
    %30 = vector.broadcast %28 : vector<16x1xf32> to vector<16x16xf32>
    %31 = vector.broadcast %29 : vector<1x16xf32> to vector<16x16xf32>
    %32 = arith.addf %30, %31 : vector<16x16xf32>
    %33 = vector.extract_strided_slice %17 {offsets = [0, 3], sizes = [16, 1], strides = [1, 1]} : vector<16x4xf32> to vector<16x1xf32>
    %34 = vector.extract_strided_slice %16 {offsets = [3, 0], sizes = [1, 16], strides = [1, 1]} : vector<4x16xf32> to vector<1x16xf32>
    %35 = vector.broadcast %33 : vector<16x1xf32> to vector<16x16xf32>
    %36 = vector.broadcast %34 : vector<1x16xf32> to vector<16x16xf32>
    %37 = arith.addf %35, %36 : vector<16x16xf32>
    %38 = vector.shape_cast %22 : vector<16x16xf32> to vector<1x16x16xf32>
    %39 = vector.shape_cast %27 : vector<16x16xf32> to vector<1x16x16xf32>
    %40 = vector.shape_cast %32 : vector<16x16xf32> to vector<1x16x16xf32>
    %41 = vector.shape_cast %37 : vector<16x16xf32> to vector<1x16x16xf32>
    %42 = tpu.concatenate %38, %39, %40, %41 in 0 : vector<1x16x16xf32>, vector<1x16x16xf32>, vector<1x16x16xf32>, vector<1x16x16xf32> -> vector<4x16x16xf32>
    %43 = vector.shape_cast %11 : vector<16x16xi1> to vector<1x16x16xi1>
    %cst_15 = arith.constant 0.000000e+00 : f32
    %44 = vector.broadcast %cst_15 : f32 to vector<4x16x16xf32>
    %45 = arith.cmpf oge, %42, %44 : vector<4x16x16xf32>
    %cst_16 = arith.constant 2.000000e-01 : f32
    %46 = vector.broadcast %cst_16 : f32 to vector<4x16x16xf32>
    %47 = arith.mulf %46, %42 : vector<4x16x16xf32>
    %48 = arith.select %45, %42, %47 : vector<4x16x16xi1>, vector<4x16x16xf32>
    %cst_17 = arith.constant -1.000000e+30 : f32
    %49 = vector.shape_cast %43 : vector<1x16x16xi1> to vector<1x16x16xi1>
    %50 = vector.broadcast %49 : vector<1x16x16xi1> to vector<4x16x16xi1>
    %51 = vector.broadcast %cst_17 : f32 to vector<4x16x16xf32>
    %52 = arith.select %50, %48, %51 : vector<4x16x16xi1>, vector<4x16x16xf32>
    %cst_18 = arith.constant dense<0xFF800000> : vector<4x16xf32>
    %53 = vector.multi_reduction <maximumf>, %52, %cst_18 [2] : vector<4x16x16xf32> to vector<4x16xf32>
    %54 = vector.shape_cast %53 : vector<4x16xf32> to vector<4x16x1xf32>
    %55 = vector.broadcast %54 : vector<4x16x1xf32> to vector<4x16x16xf32>
    %56 = arith.subf %52, %55 : vector<4x16x16xf32>
    %57 = math.exp %56 : vector<4x16x16xf32>
    %cst_19 = arith.constant dense<0.000000e+00> : vector<4x16xf32>
    %58 = vector.multi_reduction <add>, %57, %cst_19 [2] : vector<4x16x16xf32> to vector<4x16xf32>
    %59 = vector.shape_cast %58 : vector<4x16xf32> to vector<4x16x1xf32>
    %cst_20 = arith.constant 9.99999968E-21 : f32
    %60 = vector.broadcast %cst_20 : f32 to vector<4x16x1xf32>
    %61 = arith.maximumf %59, %60 : vector<4x16x1xf32>
    %62 = tpu.reciprocal %61 {approx = true} : vector<4x16x1xf32> -> vector<4x16x1xf32>
    %63 = vector.broadcast %62 : vector<4x16x1xf32> to vector<4x16x16xf32>
    %64 = arith.mulf %57, %63 : vector<4x16x16xf32>
    %65 = vector.extract_strided_slice %64 {offsets = [0, 0, 0], sizes = [1, 16, 16], strides = [1, 1, 1]} : vector<4x16x16xf32> to vector<1x16x16xf32>
    %66 = vector.shape_cast %65 : vector<1x16x16xf32> to vector<16x16xf32>
    %67 = vector.extract_strided_slice %13 {offsets = [0, 0], sizes = [16, 8], strides = [1, 1]} : vector<16x32xf32> to vector<16x8xf32>
    %cst_21 = arith.constant dense<0.000000e+00> : vector<16x8xf32>
    %68 = tpu.matmul %66, %67, %cst_21 {dimension_numbers = #tpu.dot_dimension_numbers<[1], [0], [0], [1], [0, 0, 1, 1], [], []>} : vector<16x16xf32>, vector<16x8xf32>, vector<16x8xf32> -> vector<16x8xf32>
    %69 = vector.extract_strided_slice %64 {offsets = [1, 0, 0], sizes = [1, 16, 16], strides = [1, 1, 1]} : vector<4x16x16xf32> to vector<1x16x16xf32>
    %70 = vector.shape_cast %69 : vector<1x16x16xf32> to vector<16x16xf32>
    %71 = vector.extract_strided_slice %13 {offsets = [0, 8], sizes = [16, 8], strides = [1, 1]} : vector<16x32xf32> to vector<16x8xf32>
    %cst_22 = arith.constant dense<0.000000e+00> : vector<16x8xf32>
    %72 = tpu.matmul %70, %71, %cst_22 {dimension_numbers = #tpu.dot_dimension_numbers<[1], [0], [0], [1], [0, 0, 1, 1], [], []>} : vector<16x16xf32>, vector<16x8xf32>, vector<16x8xf32> -> vector<16x8xf32>
    %73 = vector.extract_strided_slice %64 {offsets = [2, 0, 0], sizes = [1, 16, 16], strides = [1, 1, 1]} : vector<4x16x16xf32> to vector<1x16x16xf32>
    %74 = vector.shape_cast %73 : vector<1x16x16xf32> to vector<16x16xf32>
    %75 = vector.extract_strided_slice %13 {offsets = [0, 16], sizes = [16, 8], strides = [1, 1]} : vector<16x32xf32> to vector<16x8xf32>
    %cst_23 = arith.constant dense<0.000000e+00> : vector<16x8xf32>
    %76 = tpu.matmul %74, %75, %cst_23 {dimension_numbers = #tpu.dot_dimension_numbers<[1], [0], [0], [1], [0, 0, 1, 1], [], []>} : vector<16x16xf32>, vector<16x8xf32>, vector<16x8xf32> -> vector<16x8xf32>
    %77 = vector.extract_strided_slice %64 {offsets = [3, 0, 0], sizes = [1, 16, 16], strides = [1, 1, 1]} : vector<4x16x16xf32> to vector<1x16x16xf32>
    %78 = vector.shape_cast %77 : vector<1x16x16xf32> to vector<16x16xf32>
    %79 = vector.extract_strided_slice %13 {offsets = [0, 24], sizes = [16, 8], strides = [1, 1]} : vector<16x32xf32> to vector<16x8xf32>
    %cst_24 = arith.constant dense<0.000000e+00> : vector<16x8xf32>
    %80 = tpu.matmul %78, %79, %cst_24 {dimension_numbers = #tpu.dot_dimension_numbers<[1], [0], [0], [1], [0, 0, 1, 1], [], []>} : vector<16x16xf32>, vector<16x8xf32>, vector<16x8xf32> -> vector<16x8xf32>
    %81 = tpu.concatenate %68, %72, %76, %80 in 1 : vector<16x8xf32>, vector<16x8xf32>, vector<16x8xf32>, vector<16x8xf32> -> vector<16x32xf32>
    %82 = vector.broadcast %2 : vector<1x32xf32> to vector<16x32xf32>
    %83 = arith.addf %81, %82 : vector<16x32xf32>
    %cst_25 = arith.constant 0.000000e+00 : f32
    %84 = vector.broadcast %cst_25 : f32 to vector<16x32xf32>
    %85 = arith.cmpf ogt, %83, %84 : vector<16x32xf32>
    %86 = math.exp %83 : vector<16x32xf32>
    %cst_26 = arith.constant 1.000000e+00 : f32
    %87 = vector.broadcast %cst_26 : f32 to vector<16x32xf32>
    %88 = arith.subf %86, %87 : vector<16x32xf32>
    %89 = arith.select %85, %83, %88 : vector<16x32xi1>, vector<16x32xf32>
    %cst_27 = arith.constant dense<0.000000e+00> : vector<16x8xf32>
    %90 = tpu.matmul %89, %3, %cst_27 {dimension_numbers = #tpu.dot_dimension_numbers<[1], [0], [0], [1], [0, 0, 1, 1], [], []>} : vector<16x32xf32>, vector<32x8xf32>, vector<16x8xf32> -> vector<16x8xf32>
    %cst_28 = arith.constant dense<0.000000e+00> : vector<16x2xf32>
    %91 = tpu.matmul %90, %4, %cst_28 {dimension_numbers = #tpu.dot_dimension_numbers<[1], [0], [0], [1], [0, 0, 1, 1], [], []>} : vector<16x8xf32>, vector<8x2xf32>, vector<16x2xf32> -> vector<16x2xf32>
    %92 = vector.extract_strided_slice %91 {offsets = [0, 1], sizes = [16, 1], strides = [1, 1]} : vector<16x2xf32> to vector<16x1xf32>
    %93 = vector.extract_strided_slice %91 {offsets = [0, 0], sizes = [16, 1], strides = [1, 1]} : vector<16x2xf32> to vector<16x1xf32>
    %94 = tpu.transpose %93, [1, 0] : vector<16x1xf32> -> vector<1x16xf32>
    %95 = vector.broadcast %92 : vector<16x1xf32> to vector<16x16xf32>
    %96 = vector.broadcast %94 : vector<1x16xf32> to vector<16x16xf32>
    %97 = arith.addf %95, %96 : vector<16x16xf32>
    %cst_29 = arith.constant 0.000000e+00 : f32
    %98 = vector.broadcast %cst_29 : f32 to vector<16x16xf32>
    %99 = arith.cmpf oge, %97, %98 : vector<16x16xf32>
    %cst_30 = arith.constant 2.000000e-01 : f32
    %100 = vector.broadcast %cst_30 : f32 to vector<16x16xf32>
    %101 = arith.mulf %100, %97 : vector<16x16xf32>
    %102 = arith.select %99, %97, %101 : vector<16x16xi1>, vector<16x16xf32>
    %cst_31 = arith.constant -1.000000e+30 : f32
    %103 = vector.broadcast %cst_31 : f32 to vector<16x16xf32>
    %104 = arith.select %11, %102, %103 : vector<16x16xi1>, vector<16x16xf32>
    %cst_32 = arith.constant dense<0xFF800000> : vector<16xf32>
    %105 = vector.multi_reduction <maximumf>, %104, %cst_32 [1] : vector<16x16xf32> to vector<16xf32>
    %106 = vector.shape_cast %105 : vector<16xf32> to vector<16x1xf32>
    %107 = vector.broadcast %106 : vector<16x1xf32> to vector<16x16xf32>
    %108 = arith.subf %104, %107 : vector<16x16xf32>
    %109 = math.exp %108 : vector<16x16xf32>
    %cst_33 = arith.constant dense<0.000000e+00> : vector<16xf32>
    %110 = vector.multi_reduction <add>, %109, %cst_33 [1] : vector<16x16xf32> to vector<16xf32>
    %111 = vector.shape_cast %110 : vector<16xf32> to vector<16x1xf32>
    %cst_34 = arith.constant 9.99999968E-21 : f32
    %112 = vector.broadcast %cst_34 : f32 to vector<16x1xf32>
    %113 = arith.maximumf %111, %112 : vector<16x1xf32>
    %114 = tpu.reciprocal %113 {approx = true} : vector<16x1xf32> -> vector<16x1xf32>
    %115 = vector.broadcast %114 : vector<16x1xf32> to vector<16x16xf32>
    %116 = arith.mulf %109, %115 : vector<16x16xf32>
    %cst_35 = arith.constant dense<0.000000e+00> : vector<16x8xf32>
    %117 = tpu.matmul %116, %90, %cst_35 {dimension_numbers = #tpu.dot_dimension_numbers<[1], [0], [0], [1], [0, 0, 1, 1], [], []>} : vector<16x16xf32>, vector<16x8xf32>, vector<16x8xf32> -> vector<16x8xf32>
    %118 = vector.broadcast %5 : vector<1x8xf32> to vector<16x8xf32>
    %119 = arith.addf %117, %118 : vector<16x8xf32>
    %cst_36 = arith.constant 0.000000e+00 : f32
    %120 = vector.broadcast %cst_36 : f32 to vector<16x8xf32>
    %121 = arith.cmpf ogt, %119, %120 : vector<16x8xf32>
    %122 = math.exp %119 : vector<16x8xf32>
    %cst_37 = arith.constant 1.000000e+00 : f32
    %123 = vector.broadcast %cst_37 : f32 to vector<16x8xf32>
    %124 = arith.subf %122, %123 : vector<16x8xf32>
    %125 = arith.select %121, %119, %124 : vector<16x8xi1>, vector<16x8xf32>
    %cst_38 = arith.constant dense<0.000000e+00> : vector<16x16xf32>
    %126 = tpu.matmul %125, %6, %cst_38 {dimension_numbers = #tpu.dot_dimension_numbers<[1], [0], [0], [1], [0, 0, 1, 1], [], []>} : vector<16x8xf32>, vector<8x16xf32>, vector<16x16xf32> -> vector<16x16xf32>
    %cst_39 = arith.constant dense<0.000000e+00> : vector<16x2xf32>
    %127 = tpu.matmul %126, %7, %cst_39 {dimension_numbers = #tpu.dot_dimension_numbers<[1], [0], [0], [1], [0, 0, 1, 1], [], []>} : vector<16x16xf32>, vector<16x2xf32>, vector<16x2xf32> -> vector<16x2xf32>
    %128 = vector.extract_strided_slice %127 {offsets = [0, 1], sizes = [16, 1], strides = [1, 1]} : vector<16x2xf32> to vector<16x1xf32>
    %129 = vector.extract_strided_slice %127 {offsets = [0, 0], sizes = [16, 1], strides = [1, 1]} : vector<16x2xf32> to vector<16x1xf32>
    %130 = tpu.transpose %129, [1, 0] : vector<16x1xf32> -> vector<1x16xf32>
    %131 = vector.broadcast %128 : vector<16x1xf32> to vector<16x16xf32>
    %132 = vector.broadcast %130 : vector<1x16xf32> to vector<16x16xf32>
    %133 = arith.addf %131, %132 : vector<16x16xf32>
    %cst_40 = arith.constant 0.000000e+00 : f32
    %134 = vector.broadcast %cst_40 : f32 to vector<16x16xf32>
    %135 = arith.cmpf oge, %133, %134 : vector<16x16xf32>
    %cst_41 = arith.constant 2.000000e-01 : f32
    %136 = vector.broadcast %cst_41 : f32 to vector<16x16xf32>
    %137 = arith.mulf %136, %133 : vector<16x16xf32>
    %138 = arith.select %135, %133, %137 : vector<16x16xi1>, vector<16x16xf32>
    %cst_42 = arith.constant -1.000000e+30 : f32
    %139 = vector.broadcast %cst_42 : f32 to vector<16x16xf32>
    %140 = arith.select %11, %138, %139 : vector<16x16xi1>, vector<16x16xf32>
    %cst_43 = arith.constant dense<0xFF800000> : vector<16xf32>
    %141 = vector.multi_reduction <maximumf>, %140, %cst_43 [1] : vector<16x16xf32> to vector<16xf32>
    %142 = vector.shape_cast %141 : vector<16xf32> to vector<16x1xf32>
    %143 = vector.broadcast %142 : vector<16x1xf32> to vector<16x16xf32>
    %144 = arith.subf %140, %143 : vector<16x16xf32>
    %145 = math.exp %144 : vector<16x16xf32>
    %cst_44 = arith.constant dense<0.000000e+00> : vector<16xf32>
    %146 = vector.multi_reduction <add>, %145, %cst_44 [1] : vector<16x16xf32> to vector<16xf32>
    %147 = vector.shape_cast %146 : vector<16xf32> to vector<16x1xf32>
    %cst_45 = arith.constant 9.99999968E-21 : f32
    %148 = vector.broadcast %cst_45 : f32 to vector<16x1xf32>
    %149 = arith.maximumf %147, %148 : vector<16x1xf32>
    %150 = tpu.reciprocal %149 {approx = true} : vector<16x1xf32> -> vector<16x1xf32>
    %151 = vector.broadcast %150 : vector<16x1xf32> to vector<16x16xf32>
    %152 = arith.mulf %145, %151 : vector<16x16xf32>
    %cst_46 = arith.constant dense<0.000000e+00> : vector<16x16xf32>
    %153 = tpu.matmul %152, %126, %cst_46 {dimension_numbers = #tpu.dot_dimension_numbers<[1], [0], [0], [1], [0, 0, 1, 1], [], []>} : vector<16x16xf32>, vector<16x16xf32>, vector<16x16xf32> -> vector<16x16xf32>
    %154 = vector.broadcast %8 : vector<1x16xf32> to vector<16x16xf32>
    %155 = arith.addf %153, %154 : vector<16x16xf32>
    %c0_47 = arith.constant 0 : index
    %c0_48 = arith.constant 0 : index
    %156 = vector.load %arg3[%c0_47, %c0_48] : memref<16x16xf32, #tpu.memory_space<vmem>>, vector<16x16xf32>
    tpu.vector_store %arg3[%c0_47, %c0_48], %155 {strides = array<i32>} : memref<16x16xf32, #tpu.memory_space<vmem>>, vector<16x16xf32>,
    return
  }
}

</mosaic_0001>

<bundles_post_ra>
// kernel: tpu_custom_call.1
= control target key start
LH: loop header
LB: loop body
LE: loop exit
PB: predicated region body
PF: predicated region fallthrough
CT: control target
= control target key end

     0   :  { %vm44_vm0 = vcmask 1043456   ;;  %vm37_vm1 = vcmask 31744   ;;  %s2065_s0 = inlined_call_operand.vmem [shape: f32[16,4], index: 0, kind: input, shape index: {}]   ;;  %s2066_s1 = inlined_call_operand.vmem [shape: f32[16,16], index: 1, kind: input, shape index: {}]   ;;  %s2067_s2 = inlined_call_operand.vmem [shape: f32[128,32], index: 2, kind: input, shape index: {}]   ;;  %s2068_s3 = inlined_call_operand.hbm [shape: f32[16,16], index: 3, kind: output, shape index: {}]  }
   0x1   :  { %v15_v0 = vld [vmem:[%s2067_s2] sm:$0xf]  ;;  %v36_v2 = vld [vmem:[%s2065_s0 + $0x8] sm:$0xff]  ;;  %v17_v4 = vld [vmem:[%s2067_s2 + $0x10] sm:$0xff] }
   0x2   :  { %v35_v1 = vld [vmem:[%s2065_s0] sm:$0xff]  ;;  %1581 = vmatprep.subr.msk.mxu0 %vm44_vm0, %v15_v0  ;;  %v16_v3 = vld [vmem:[%s2067_s2 + $0x8] sm:$0xff]  ;;  %v18_v5 = vld [vmem:[%s2067_s2 + $0x18] sm:$0xff] }
   0x3   :  { %1583 = vmatprep.mubr.msk.f32.mxu0 %vm37_vm1, %v35_v1  ;;  %1582 = vmatpush3.msk.msra.mxu0 %vm44_vm0, %v15_v0  ;;  %v1667_v6 = vpack.c.bf16 %v17_v4, %v16_v3  ;;  %v19_v7 = vld [vmem:[%s2067_s2 + $0x20] sm:$0xff] }
   0x4   :  { %8 = vsyncpa [#allocation3], 0  ;;  %1584 = vmatmul.mubr.msk.f32.vlgmr.msra.gmra.mrb[0].mxu0 %vm37_vm1, %v36_v2  ;;  %v1671_v8 = vpack.c.bf16 %v19_v7, %v18_v5  ;;  %v1829_v9 = vmov 5   ;;  %v1830_v10 = vmov 4   ;;  %vm123_vm2 = vcmask 261120   ;;  %v1893_v33 = vld [vmem:[%s2066_s1 + $0x8] sm:$0xff] }
   0x5   :  { %1668 = vmatprep.subr.bf16.mxu1 %v1667_v6  ;;  %1726 = vset.pattern.permute.xlu1 %v1829_v9  ;;  %v1831_v17 = vmov 6   ;;  %v1832_v18 = vmov 7   ;;  %v247_v21 = vlaneseq  ;;  %vm34_vm3 = vcmp.gt.f32.partialorder %v1893_v33, 0.0  ;;  %v1899_v45 = vld [vmem:[%s2066_s1] sm:$0xff]  ;;  %s1833_s1 = smov 120   ;;  %s1834_s29 = smov 104  }
   0x6   :  { %1670 = vmatpush3.bf16.msra.mxu1 %v1667_v6  ;;  %1725 = vset.pattern.permute.xlu0 %v1830_v10  ;;  %vm331_vm6 = vcmask 130048   ;;  %vm33_vm9 = vcmp.gt.f32.partialorder %v1899_v45, 0.0  ;;  %s1835_s30 = smov 112   ;;  %s1836_s4 = smov 16   ;;  %vm794_vm14 = vcmask 64512   ;;  %vm799_vm15 = vcmask 195584  }
   0x7   :  { %1672 = vmatprep.subr.bf16.mxu1 %v1671_v8  ;;  %v248_v23 = vshrl.u32 %v247_v21, 7  ;;  %s1837_s13 = smov 8   ;;  %s1838_s14 = smov 24  }
   0x8   :  { %s1840_s28 = smov [#allocation2]  }
   0x9   :  { %v1887_v26 = vsub.s32 0, %v248_v23  ;;  %v263_v27 = vsub.s32 1, %v248_v23  ;;  %v277_v28 = vsub.s32 2, %v248_v23  ;;  %v291_v41 = vsub.s32 3, %v248_v23 }
   0xa   :  { %1674 = vmatpush3.bf16.msra.mxu1 %v1671_v8 }
  0xd7   :  { %v1585_v11 = vpop.f32.mrb[0].mxu0 }
  0xd8   :  { %v114_v12 = vpop.f32.mrb[1].mxu0 }
  0xd9   :  { %1594 = vmatprep.mubr.msk.f32.mxu1 %vm123_vm2, %v114_v12  ;;  %v1675_v13 = vpack.c.bf16 %v1585_v11, %v114_v12  ;;  %v1884_v14 = vpack.i.bf16 %v1585_v11, %v114_v12 }
  0xda   :  { %1595 = vmatmul.mubr.msk.f32.vlgmr.msra.gmra.mrb[0].mxu1 %vm123_vm2, %v1585_v11 }
  0xdb   :  { %1676 = vmatprep.subr.bf16.mxu0 %v1675_v13 }
  0xdc   :  { %1678 = vmatpush3.bf16.msra.mxu0 %v1675_v13 }
 0x1ad   :  { %v1596_v15 = vpop.f32.mrb[0].mxu1 }
 0x1ae   :  { %258 = vperm.xlu1 %1726, %v1596_v15   ;;  %244 = vperm.xlu0 %1725, %v1596_v15   ;;  %v196_v16 = vpop.f32.mrb[1].mxu1 }
 0x1b2   :  { %1727 = vset.pattern.permute.xlu1 %v1831_v17  ;;  %239 = vperm.xlu0 %1725, %v196_v16  }
 0x1b3   :  { %272 = vperm.xlu1 %1727, %v1596_v15  }
 0x1b6   :  { %1729 = vset.pattern.permute.xlu0 %v1831_v17 }
 0x1b7   :  { %1728 = vset.pattern.permute.xlu1 %v1829_v9  ;;  %268 = vperm.xlu0 %1729, %v196_v16  }
 0x1b8   :  { %254 = vperm.xlu1 %1728, %v196_v16  }
 0x1bb   :  { %1730 = vset.pattern.permute.xlu0 %v1832_v18 }
 0x1bc   :  { %1731 = vset.pattern.permute.xlu1 %v1832_v18  ;;  %286 = vperm.xlu0 %1730, %v1596_v15  }
 0x1bd   :  { %282 = vperm.xlu1 %1731, %v196_v16  }
 0x1e6   :  { %205 = vxpose.xlu1.b32.start [1/2] (short) (narrow) %v196_v16, 8 }
 0x1ea   :  { %206 = vxpose.xlu1.b32.end [2/2] (short) (narrow) %v1596_v15, 8 }
 0x22d   :  { %v259_v19 = vpop.permute.xlu1 %258  ;;  %v245_v24 = vpop.permute.xlu0 %244 }
 0x231   :  { %v240_v34 = vpop.permute.xlu0 %239 }
 0x232   :  { %v273_v20 = vpop.permute.xlu1 %272 }
 0x236   :  { %v269_v53 = vpop.permute.xlu0 %268 }
 0x237   :  { %v255_v22 = vpop.permute.xlu1 %254 }
 0x23b   :  { %v287_v1 = vpop.permute.xlu0 %286 }
 0x23c   :  { %v283_v25 = vpop.permute.xlu1 %282 }
 0x266   :  { %v221_v29 = vpop.trf.xlu1 }
 0x267   :  { %v250_v30 = vrot.slane %v221_v29, %v1887_v26  ;;  %v264_v31 = vrot.slane %v221_v29, %v263_v27  ;;  %v278_v32 = vrot.slane %v221_v29, %v277_v28  ;;  %v292_v55 = vrot.slane %v221_v29, %v291_v41 }
 0x269   :  { %v266_v35 = vadd.f32 %v264_v31, %v259_v19  ;;  %v252_v36 = vadd.f32 %v250_v30, %v245_v24  ;;  %v280_v37 = vadd.f32 %v278_v32, %v273_v20  ;;  %v251_v38 = vadd.f32 %v250_v30, %v240_v34 }
 0x26a   :  { %v265_v47 = vadd.f32 %v264_v31, %v255_v22  ;;  %v279_v58 = vadd.f32 %v278_v32, %v269_v53  ;;  %v293_v63 = vadd.f32 %v292_v55, %v283_v25  ;;  %v294_v5 = vadd.f32 %v292_v55, %v287_v1 }
 0x26b   :  { %vm298_vm4 = vcmp.ge.f32.partialorder %v266_v35, 0.0  ;;  %v306_v39 = vmul.f32 0.2, %v266_v35  ;;  %vm296_vm5 = vcmp.ge.f32.partialorder %v252_v36, 0.0  ;;  %v304_v40 = vmul.f32 0.2, %v252_v36 }
 0x26c   :  { %vm300_vm7 = vcmp.ge.f32.partialorder %v280_v37, 0.0  ;;  %v308_v42 = vmul.f32 0.2, %v280_v37  ;;  %v303_v46 = vmul.f32 0.2, %v251_v38  ;;  %vm295_vm8 = vcmp.ge.f32.partialorder %v251_v38, 0.0 }
 0x26d   :  { %v314_v43 = vsel %vm298_vm4, %v266_v35, %v306_v39  ;;  %v312_v44 = vsel %vm296_vm5, %v252_v36, %v304_v40  ;;  %v305_v57 = vmul.f32 0.2, %v265_v47  ;;  %vm297_vm10 = vcmp.ge.f32.partialorder %v265_v47, 0.0 }
 0x26e   :  { %v326_v48 = vsel %vm34_vm3, %v314_v43, -1e+30  ;;  %v324_v49 = vsel %vm34_vm3, %v312_v44, -1e+30  ;;  %v316_v50 = vsel %vm300_vm7, %v280_v37, %v308_v42  ;;  %v311_v56 = vsel %vm295_vm8, %v251_v38, %v303_v46 }
 0x26f   :  { %v341_v51 = vsel %vm331_vm6, %v326_v48, -inf  ;;  %v335_v52 = vsel %vm331_vm6, %v324_v49, -inf  ;;  %v328_v54 = vsel %vm34_vm3, %v316_v50, -1e+30  ;;  %v1913_v60 = vsel %vm33_vm9, %v311_v56, -1e+30 }
 0x270   :  { %342 = vmax.xlane.f32.xlu1 %v341_v51  ;;  %336 = vmax.xlane.f32.xlu0 %v335_v52  ;;  %v347_v59 = vsel %vm331_vm6, %v328_v54, -inf  ;;  %v313_v61 = vsel %vm297_vm10, %v265_v47, %v305_v57  ;;  %v307_v62 = vmul.f32 0.2, %v279_v58  ;;  %vm299_vm11 = vcmp.ge.f32.partialorder %v279_v58, 0.0 }
 0x271   :  { %v332_v0 = vsel %vm331_vm6, %v1913_v60, -inf  ;;  %v1919_v2 = vsel %vm33_vm9, %v313_v61, -1e+30  ;;  %v309_v4 = vmul.f32 0.2, %v293_v63  ;;  %vm301_vm12 = vcmp.ge.f32.partialorder %v293_v63, 0.0 }
 0x272   :  { %v315_v3 = vsel %vm299_vm11, %v279_v58, %v307_v62  ;;  %v338_v6 = vsel %vm331_vm6, %v1919_v2, -inf  ;;  %v310_v9 = vmul.f32 0.2, %v294_v5  ;;  %vm302_vm13 = vcmp.ge.f32.partialorder %v294_v5, 0.0 }
 0x273   :  { %v327_v7 = vsel %vm33_vm9, %v315_v3, -1e+30  ;;  %v317_v8 = vsel %vm301_vm12, %v293_v63, %v309_v4 }
 0x274   :  { %348 = vmax.xlane.f32.xlu0 %v347_v59  ;;  %v344_v10 = vsel %vm331_vm6, %v327_v7, -inf  ;;  %v329_v11 = vsel %vm33_vm9, %v317_v8, -1e+30  ;;  %v318_v12 = vsel %vm302_vm13, %v294_v5, %v310_v9 }
 0x275   :  { %v350_v13 = vsel %vm331_vm6, %v329_v11, -inf  ;;  %v330_v15 = vsel %vm34_vm3, %v318_v12, -1e+30 }
 0x276   :  { %v353_v16 = vsel %vm331_vm6, %v330_v15, -inf }
 0x278   :  { %333 = vmax.xlane.f32.xlu0 %v332_v0 }
 0x27c   :  { %339 = vmax.xlane.f32.xlu0 %v338_v6 }
 0x280   :  { %345 = vmax.xlane.f32.xlu0 %v344_v10 }
 0x281   :  { %1733 = vrot.lane.b32.xlu1 %v1884_v14, %s1833_s1  ;;  %s1489_s1 = sshll.u32 %s1840_s28, 4  ;;  %s1490_s1 = int_to_ptr.vmem [resolvable:$true] %s1489_s1 }
 0x282   :  { %p1810_p1 = scmp.lt.s32.totalorder %s1490_s1, %s1490_s1 }
 0x284   :  { %351 = vmax.xlane.f32.xlu0 %v350_v13 }
 0x288   :  { %354 = vmax.xlane.f32.xlu0 %v353_v16 }
 0x2fd   :  { %v343_v17 = vpop.xlane.xlu1 %342  ;;  %v337_v18 = vpop.xlane.xlu0 %336 }
 0x2fe   :  { %v359_v19 = vsub.f32 %v326_v48, %v343_v17  ;;  %v357_v20 = vsub.f32 %v324_v49, %v337_v18 }
 0x300   :  { %v366_v21 = vmul.f32 1.442695, %v357_v20  ;;  %v370_v22 = vmul.f32 1.442695, %v359_v19 }
 0x301   :  { %v1734_v23 = vpop.permute.xlu1 %1733  ;;  %v349_v24 = vpop.xlane.xlu0 %348 }
 0x302   :  { %v1736_v25 = vunpack.i.h.bf16 %v1734_v23  ;;  %v1735_v27 = vunpack.i.l.bf16 %v1734_v23  ;;  %v361_v28 = vsub.f32 %v328_v54, %v349_v24  ;;  %1749 = vpow2.f32 %v366_v21 }
 0x303   :  { %1751 = vpow2.f32 %v370_v22 }
 0x304   :  { %v1933_v29 = vpack.c.bf16 %v1736_v25, %v1735_v27  ;;  %v374_v30 = vmul.f32 1.442695, %v361_v28 }
 0x305   :  { %v334_v31 = vpop.xlane.xlu0 %333 }
 0x306   :  { %1680 = vmatprep.subr.bf16.mxu0 %v1933_v29  ;;  %1753 = vpow2.f32 %v374_v30  ;;  %v356_v42 = vsub.f32 %v1913_v60, %v334_v31 }
 0x308   :  { %v364_v48 = vmul.f32 1.442695, %v356_v42 }
 0x309   :  { %v340_v32 = vpop.xlane.xlu0 %339 }
 0x30a   :  { %v358_v49 = vsub.f32 %v1919_v2, %v340_v32 }
 0x30c   :  { %v1936_v34 = vpop.eup %1749  ;;  %v368_v51 = vmul.f32 1.442695, %v358_v49 }
 0x30d   :  { %v346_v35 = vpop.xlane.xlu0 %345  ;;  %v383_v36 = vsel %vm331_vm6, %v1936_v34, 0.0  ;;  %v1940_v37 = vpop.eup %1751 }
 0x30e   :  { %384 = vadd.xlane.f32.xlu0 %v383_v36  ;;  %v389_v40 = vsel %vm331_vm6, %v1940_v37, 0.0  ;;  %v360_v52 = vsub.f32 %v327_v7, %v346_v35 }
 0x310   :  { %v1944_v41 = vpop.eup %1753  ;;  %v372_v54 = vmul.f32 1.442695, %v360_v52  ;;  %v22_v52 = vld [vmem:[%s2067_s2 + $0x38] sm:$0xff] }
 0x311   :  { %v352_v38 = vpop.xlane.xlu0 %351  ;;  %v395_v47 = vsel %vm331_vm6, %v1944_v41, 0.0 }
 0x312   :  { %v362_v39 = vsub.f32 %v329_v11, %v352_v38  ;;  %390 = vadd.xlane.f32.xlu0 %v389_v40 }
 0x314   :  { %v376_v43 = vmul.f32 1.442695, %v362_v39 }
 0x315   :  { %v355_v44 = vpop.xlane.xlu0 %354 }
 0x316   :  { %1755 = vpow2.f32 %v376_v43  ;;  %v363_v46 = vsub.f32 %v330_v15, %v355_v44  ;;  %396 = vadd.xlane.f32.xlu0 %v395_v47 }
 0x318   :  { %v378_v50 = vmul.f32 1.442695, %v363_v46 }
 0x31a   :  { %1757 = vpow2.f32 %v378_v50 }
 0x31b   :  { %1759 = vpow2.f32 %v364_v48 }
 0x31c   :  { %1761 = vpow2.f32 %v368_v51 }
 0x31d   :  { %1763 = vpow2.f32 %v372_v54 }
 0x320   :  { %v1950_v53 = vpop.eup %1755 }
 0x321   :  { %v398_v55 = vsel %vm331_vm6, %v1950_v53, 0.0 }
 0x322   :  { %399 = vadd.xlane.f32.xlu1 %v398_v55  ;;  %v24_v55 = vld [vmem:[%s2067_s2 + $0x48] sm:$0xff] }
 0x324   :  { %v1954_v56 = vpop.eup %1757 }
 0x325   :  { %v401_v57 = vsel %vm331_vm6, %v1954_v56, 0.0  ;;  %v1760_v58 = vpop.eup %1759 }
 0x326   :  { %402 = vadd.xlane.f32.xlu0 %v401_v57  ;;  %v380_v59 = vsel %vm331_vm6, %v1760_v58, 0.0  ;;  %v1762_v60 = vpop.eup %1761  ;;  %v25_v57 = vld [vmem:[%s2067_s2 + $0x50] sm:$0xff] }
 0x327   :  { %v386_v61 = vsel %vm331_vm6, %v1762_v60, 0.0  ;;  %v1960_v62 = vpop.eup %1763 }
 0x328   :  { %v392_v63 = vsel %vm331_vm6, %v1960_v62, 0.0 }
 0x32a   :  { %381 = vadd.xlane.f32.xlu0 %v380_v59 }
 0x32e   :  { %387 = vadd.xlane.f32.xlu0 %v386_v61 }
 0x332   :  { %393 = vadd.xlane.f32.xlu0 %v392_v63 }
 0x333   :  { %1743 = vrot.lane.b32.xlu1 %v1884_v14, %s1834_s29  ;;  %s1805_s29 = scalar_lea.vmem %s1490_s1, 256 }
 0x334   :  { %p1806_p0 = scmp.ne.s32.totalorder %s1490_s1, %s1805_s29  ;;  %p1811_p2 = scmp.lt.s32.totalorder %s1805_s29, %s1805_s29 }
 0x336   :  { %p1812_p3 = por %p1811_p2, %p1810_p1 }
 0x338   :  { %p1813_p4 = pnand %p1812_p3, %p1806_p0 }
 0x348   :  { %1738 = vrot.lane.b32.xlu0 %v1884_v14, %s1835_s30 }
 0x39b   :  { %v385_v0 = vpop.xlane.xlu0 %384 }
 0x39c   :  { %v405_v4 = vmax.f32 %v385_v0, 1e-20  ;;  %v1513_v0 = vld [vmem:[%s2067_s2 + $0x28] ss:$0 sm:$0xff] }
 0x39e   :  { %1765 = vrcp.f32 %v405_v4 }
 0x39f   :  { %v391_v1 = vpop.xlane.xlu0 %390 }
 0x3a0   :  { %v407_v7 = vmax.f32 %v391_v1, 1e-20 }
 0x3a3   :  { %v397_v2 = vpop.xlane.xlu0 %396 }
 0x3a4   :  { %v409_v11 = vmax.f32 %v397_v2, 1e-20 }
 0x3a8   :  { %v1766_v17 = vpop.eup %1765 }
 0x3a9   :  { %v421_v28 = vmul.f32 %v1766_v17, %v1936_v34  ;;  %v1839_v17 = vmov 1  }
 0x3aa   :  { %1747 = vset.pattern.permute.xlu0 %v1839_v17  ;;  %1748 = vset.pattern.permute.xlu1 %v1839_v17 }
 0x3af   :  { %v400_v5 = vpop.xlane.xlu1 %399 }
 0x3b0   :  { %v410_v9 = vmax.f32 %v400_v5, 1e-20 }
 0x3b3   :  { %v403_v3 = vpop.xlane.xlu0 %402  ;;  %v1744_v16 = vpop.permute.xlu1 %1743 }
 0x3b4   :  { %v411_v13 = vmax.f32 %v403_v3, 1e-20  ;;  %v1746_v20 = vunpack.i.h.bf16 %v1744_v16  ;;  %v1745_v21 = vunpack.i.l.bf16 %v1744_v16 }
 0x3b6   :  { %v1687_v32 = vpack.c.bf16 %v1746_v20, %v1745_v21 }
 0x3b7   :  { %v382_v6 = vpop.xlane.xlu0 %381 }
 0x3b8   :  { %v404_v8 = vmax.f32 %v382_v6, 1e-20 }
 0x3ba   :  { %1767 = vrcp.f32 %v404_v8 }
 0x3bb   :  { %v388_v10 = vpop.xlane.xlu0 %387  ;;  %1769 = vrcp.f32 %v407_v7 }
 0x3bc   :  { %v406_v12 = vmax.f32 %v388_v10, 1e-20  ;;  %1771 = vrcp.f32 %v410_v9 }
 0x3be   :  { %1773 = vrcp.f32 %v406_v12 }
 0x3bf   :  { %v394_v14 = vpop.xlane.xlu0 %393  ;;  %1775 = vrcp.f32 %v409_v11 }
 0x3c0   :  { %v408_v15 = vmax.f32 %v394_v14, 1e-20  ;;  %1777 = vrcp.f32 %v411_v13 }
 0x3c2   :  { %1779 = vrcp.f32 %v408_v15 }
 0x3c3   :  { %v1739_v18 = vpop.permute.xlu0 %1738 }
 0x3c4   :  { %v1768_v19 = vpop.eup %1767  ;;  %v1741_v22 = vunpack.i.h.bf16 %v1739_v18  ;;  %v1740_v23 = vunpack.i.l.bf16 %v1739_v18 }
 0x3c5   :  { %v420_v24 = vmul.f32 %v1768_v19, %v1760_v58  ;;  %v1770_v25 = vpop.eup %1769 }
 0x3c6   :  { %v1683_v27 = vpack.c.bf16 %v1741_v22, %v1740_v23  ;;  %v1772_v30 = vpop.eup %1771  ;;  %v423_v38 = vmul.f32 %v1770_v25, %v1940_v37 }
 0x3c7   :  { %1601 = vmatprep.mubr.msk.f32.mxu0 %vm331_vm6, %v420_v24  ;;  %v426_v34 = vmul.f32 %v1772_v30, %v1950_v53  ;;  %v23_v53 = vld [vmem:[%s2067_s2 + $0x40] sm:$0xff] }
 0x3c8   :  { %v1774_v31 = vpop.eup %1773  ;;  %1602 = vmatmul.mubr.msk.f32.vlgmr.msra.gmra.mrb[2].mxu0 %vm331_vm6, %v421_v28  ;;  %1684 = vmatprep.subr.bf16.mxu1 %v1683_v27 }
 0x3c9   :  { %1682 = vmatpush3.bf16.msra.mxu0 %v1933_v29  ;;  %1686 = vmatpush3.bf16.msra.mxu1 %v1683_v27  ;;  %v422_v35 = vmul.f32 %v1774_v31, %v1762_v60  ;;  %v1776_v36 = vpop.eup %1775 }
 0x3ca   :  { %1688 = vmatprep.subr.bf16.mxu0 %v1687_v32  ;;  %v1778_v39 = vpop.eup %1777  ;;  %v425_v29 = vmul.f32 %v1776_v36, %v1944_v41  ;;  %v21_v41 = vld [vmem:[%s2067_s2 + $0x30] sm:$0xff] }
 0x3cb   :  { %1608 = vmatprep.mubr.msk.f32.mxu0 %vm331_vm6, %v422_v35  ;;  %v427_v43 = vmul.f32 %v1778_v39, %v1954_v56  ;;  %v1691_v54 = vpack.c.bf16 %v22_v52, %v21_v41  ;;  %v1695_v56 = vpack.c.bf16 %v24_v55, %v23_v53 }
 0x3cc   :  { %v1780_v40 = vpop.eup %1779  ;;  %1609 = vmatmul.mubr.msk.f32.vlgmr.msra.gmra.mrb[4].mxu0 %vm331_vm6, %v423_v38 }
 0x3cd   :  { %1690 = vmatpush3.bf16.msra.mxu0 %v1687_v32  ;;  %1622 = vmatprep.mubr.msk.f32.mxu0 %vm331_vm6, %v426_v34  ;;  %v424_v42 = vmul.f32 %v1780_v40, %v1960_v62 }
 0x3ce   :  { %1692 = vmatprep.subr.bf16.mxu1 %v1691_v54  ;;  %1636 = vmatprep.subr.mxu0 %v25_v57 }
 0x3cf   :  { %1615 = vmatprep.mubr.msk.f32.mxu1 %vm331_vm6, %v424_v42 }
 0x3d0   :  { %1616 = vmatmul.mubr.msk.f32.vlgmr.msra.gmra.mrb[2].mxu1 %vm331_vm6, %v425_v29  ;;  %1623 = vmatmul.mubr.msk.f32.vlgmr.msra.gmra.mrb[6].mxu0 %vm331_vm6, %v427_v43 }
 0x3d1   :  { %1694 = vmatpush3.bf16.msra.mxu1 %v1691_v54  ;;  %1637 = vmatpush3.msra.mxu0 %v25_v57 }
 0x3d2   :  { %1696 = vmatprep.subr.bf16.mxu1 %v1695_v56 }
 0x3d5   :  { %1698 = vmatpush3.bf16.msra.mxu1 %v1695_v56 }
 0x49b   :  { %v1603_v37 = vpop.f32.mrb[2].mxu0 }
 0x49c   :  { %v500_v44 = vpop.f32.mrb[3].mxu0 }
 0x49f   :  { %v1610_v46 = vpop.f32.mrb[4].mxu0 }
 0x4a0   :  { %v587_v47 = vpop.f32.mrb[5].mxu0 }
 0x4a3   :  { %v1617_v48 = vpop.f32.mrb[2].mxu1  ;;  %v1624_v49 = vpop.f32.mrb[6].mxu0 }
 0x4a4   :  { %v761_v50 = vpop.f32.mrb[7].mxu0  ;;  %782 = vrot.lane.b32.xlu0 %v1617_v48, %s1836_s4  ;;  %v674_v51 = vpop.f32.mrb[3].mxu1 }
 0x4a5   :  { %780 = vrot.lane.b32.xlu1 %v674_v51, %s1836_s4 }
 0x4a8   :  { %774 = vrot.lane.b32.xlu0 %v1610_v46, %s1837_s13 }
 0x4a9   :  { %772 = vrot.lane.b32.xlu1 %v587_v47, %s1837_s13 }
 0x4ac   :  { %790 = vrot.lane.b32.xlu0 %v1624_v49, %s1838_s14 }
 0x4ad   :  { %788 = vrot.lane.b32.xlu1 %v761_v50, %s1838_s14 }
 0x516   :  { %v783_v58 = vpop.permute.xlu0 %782 }
 0x517   :  { %v781_v59 = vpop.permute.xlu1 %780 }
 0x51a   :  { %v775_v60 = vpop.permute.xlu0 %774 }
 0x51b   :  { %v796_v61 = vsel %vm794_vm14, %v1603_v37, %v775_v60  ;;  %v773_v62 = vpop.permute.xlu1 %772  ;;  %v29_v60 = vld [vmem:[%s2067_s2 + $0x70] sm:$0xff] }
 0x51c   :  { %v795_v63 = vsel %vm794_vm14, %v500_v44, %v773_v62  ;;  %v798_v1 = vsel %vm331_vm6, %v796_v61, %v783_v58  ;;  %v27_v58 = vld [vmem:[%s2067_s2 + $0x60] sm:$0xff]  ;;  %v1520_v62 = vld [vmem:[%s2067_s2 + $0x58] ss:$0 sm:$0xff] }
 0x51d   :  { %v797_v4 = vsel %vm331_vm6, %v795_v63, %v781_v59  ;;  %1648 = vmatprep.subr.mxu1 %v27_v58  ;;  %v28_v59 = vld [vmem:[%s2067_s2 + $0x68] sm:$0xff] }
 0x51e   :  { %v791_v2 = vpop.permute.xlu0 %790  ;;  %v1703_v61 = vpack.c.bf16 %v29_v60, %v28_v59 }
 0x51f   :  { %v801_v3 = vsel %vm799_vm15, %v798_v1, %v791_v2  ;;  %v789_v5 = vpop.permute.xlu1 %788 }
 0x520   :  { %v807_v6 = vadd.f32 %v1513_v0, %v801_v3  ;;  %v800_v7 = vsel %vm799_vm15, %v797_v4, %v789_v5 }
 0x521   :  { %v806_v8 = vadd.f32 %v1513_v0, %v800_v7 }
 0x522   :  { %v812_v9 = vmul.f32 1.442695, %v807_v6  ;;  %vm809_vm1 = vcmp.gt.f32.partialorder %v807_v6, 0.0 }
 0x523   :  { %v810_v10 = vmul.f32 1.442695, %v806_v8  ;;  %vm808_vm0 = vcmp.gt.f32.partialorder %v806_v8, 0.0 }
 0x524   :  { %1781 = vpow2.f32 %v812_v9 }
 0x525   :  { %1783 = vpow2.f32 %v810_v10 }
 0x52e   :  { %v1782_v11 = vpop.eup %1781 }
 0x52f   :  { %v1784_v12 = vpop.eup %1783  ;;  %v1515_v13 = vadd.f32 -1.0, %v1782_v11 }
 0x530   :  { %v1514_v14 = vadd.f32 -1.0, %v1784_v12 }
 0x531   :  { %v817_v16 = vsel %vm809_vm1, %v807_v6, %v1515_v13 }
 0x532   :  { %v816_v15 = vsel %vm808_vm0, %v806_v8, %v1514_v14 }
 0x533   :  { %1633 = vmatprep.mubr.msk.f32.mxu1 %vm123_vm2, %v816_v15 }
 0x534   :  { %1634 = vmatmul.mubr.msk.f32.vlgmr.msra.gmra.mrb[4].mxu1 %vm123_vm2, %v817_v16 }
 0x535   :  { %1649 = vmatpush3.msra.mxu1 %v27_v58 }
 0x607   :  { %v1635_v18 = vpop.f32.mrb[4].mxu1 }
 0x608   :  { %v890_v19 = vpop.f32.mrb[5].mxu1 }
 0x609   :  { %v1699_v20 = vpack.c.bf16 %v1635_v18, %v890_v19  ;;  %1638 = vmatprep.mubr.msk.f32.mxu0 %vm794_vm14, %v890_v19 }
 0x60a   :  { %1639 = vmatmul.mubr.msk.f32.vlgmr.msra.gmra.mrb[8].mxu0 %vm794_vm14, %v1635_v18 }
 0x60b   :  { %1700 = vmatprep.subr.bf16.mxu0 %v1699_v20 }
 0x60c   :  { %1702 = vmatpush3.bf16.msra.mxu0 %v1699_v20 }
 0x60d   :  { %1704 = vmatprep.subr.bf16.mxu0 %v1703_v61 }
 0x6dd   :  { %v1640_v21 = vpop.f32.mrb[8].mxu0 }
 0x6de   :  { %1019 = vperm.xlu0 %1747, %v1640_v21   ;;  %v971_v22 = vpop.f32.mrb[9].mxu0 }
 0x6df   :  { %1014 = vperm.xlu1 %1748, %v971_v22  }
 0x708   :  { %980 = vxpose.xlu1.b32.start [1/2] (short) (narrow) %v971_v22, 8 }
 0x70c   :  { %981 = vxpose.xlu1.b32.end [2/2] (short) (narrow) %v1640_v21, 8 }
 0x75d   :  { %v1020_v27 = vpop.permute.xlu0 %1019 }
 0x75e   :  { %v1015_v23 = vpop.permute.xlu1 %1014 }
 0x788   :  { %v996_v24 = vpop.trf.xlu1 }
 0x789   :  { %v1025_v25 = vrot.slane %v996_v24, %v1887_v26 }
 0x78b   :  { %v1026_v28 = vadd.f32 %v1025_v25, %v1015_v23  ;;  %v1027_v30 = vadd.f32 %v1025_v25, %v1020_v27 }
 0x78d   :  { %vm1028_vm2 = vcmp.ge.f32.partialorder %v1026_v28, 0.0  ;;  %v1030_v31 = vmul.f32 0.2, %v1026_v28  ;;  %vm1029_vm4 = vcmp.ge.f32.partialorder %v1027_v30, 0.0  ;;  %v1031_v32 = vmul.f32 0.2, %v1027_v30 }
 0x78f   :  { %v1032_v35 = vsel %vm1028_vm2, %v1026_v28, %v1030_v31  ;;  %v1033_v36 = vsel %vm1029_vm4, %v1027_v30, %v1031_v32 }
 0x790   :  { %v1034_v38 = vsel %vm33_vm9, %v1032_v35, -1e+30  ;;  %v1035_v34 = vsel %vm34_vm3, %v1033_v36, -1e+30 }
 0x791   :  { %v1036_v39 = vsel %vm331_vm6, %v1034_v38, -inf  ;;  %v1039_v40 = vsel %vm331_vm6, %v1035_v34, -inf }
 0x792   :  { %1037 = vmax.xlane.f32.xlu0 %v1036_v39 }
 0x796   :  { %1040 = vmax.xlane.f32.xlu0 %v1039_v40 }
 0x81f   :  { %v1038_v42 = vpop.xlane.xlu0 %1037 }
 0x820   :  { %v1042_v29 = vsub.f32 %v1034_v38, %v1038_v42 }
 0x822   :  { %v1044_v43 = vmul.f32 1.442695, %v1042_v29 }
 0x823   :  { %v1041_v37 = vpop.xlane.xlu0 %1040 }
 0x824   :  { %1785 = vpow2.f32 %v1044_v43  ;;  %v1043_v44 = vsub.f32 %v1035_v34, %v1041_v37 }
 0x826   :  { %v1046_v46 = vmul.f32 1.442695, %v1043_v44 }
 0x828   :  { %1787 = vpow2.f32 %v1046_v46 }
 0x82e   :  { %v1786_v47 = vpop.eup %1785 }
 0x82f   :  { %v1048_v48 = vsel %vm331_vm6, %v1786_v47, 0.0 }
 0x830   :  { %1049 = vadd.xlane.f32.xlu0 %v1048_v48 }
 0x832   :  { %v1788_v49 = vpop.eup %1787 }
 0x833   :  { %v1051_v50 = vsel %vm331_vm6, %v1788_v49, 0.0 }
 0x834   :  { %1052 = vadd.xlane.f32.xlu1 %v1051_v50 }
 0x8bd   :  { %v1050_v51 = vpop.xlane.xlu0 %1049 }
 0x8be   :  { %v1054_v41 = vmax.f32 %v1050_v51, 1e-20 }
 0x8c0   :  { %1789 = vrcp.f32 %v1054_v41 }
 0x8c1   :  { %v1053_v52 = vpop.xlane.xlu1 %1052 }
 0x8c2   :  { %v1055_v53 = vmax.f32 %v1053_v52, 1e-20 }
 0x8c4   :  { %1791 = vrcp.f32 %v1055_v53 }
 0x8ca   :  { %v1790_v54 = vpop.eup %1789 }
 0x8cb   :  { %v1058_v55 = vmul.f32 %v1790_v54, %v1786_v47 }
 0x8cd   :  { %1645 = vmatprep.mubr.msk.f32.mxu0 %vm331_vm6, %v1058_v55 }
 0x8ce   :  { %v1792_v56 = vpop.eup %1791 }
 0x8cf   :  { %v1059_v57 = vmul.f32 %v1792_v56, %v1788_v49  ;;  %v1529_v49 = vld [vmem:[%s2067_s2 + $0x78] ss:$0 sm:$0xff] }
 0x8d1   :  { %1646 = vmatmul.mubr.msk.f32.vlgmr.msra.gmra.mrb[10].mxu0 %vm331_vm6, %v1059_v57 }
 0x8d2   :  { %1706 = vmatpush3.bf16.msra.mxu0 %v1703_v61 }
 0x9a4   :  { %v1647_v63 = vpop.f32.mrb[10].mxu0 }
 0x9a5   :  { %v1142_v0 = vadd.f32 %v1647_v63, %v1520_v62  ;;  %v1136_v1 = vpop.f32.mrb[11].mxu0 }
 0x9a6   :  { %v1137_v2 = vadd.f32 %v1520_v62, %v1136_v1 }
 0x9a7   :  { %v1149_v3 = vmul.f32 1.442695, %v1142_v0  ;;  %vm1146_vm7 = vcmp.gt.f32.partialorder %v1142_v0, 0.0 }
 0x9a8   :  { %v1147_v4 = vmul.f32 1.442695, %v1137_v2  ;;  %vm1145_vm5 = vcmp.gt.f32.partialorder %v1137_v2, 0.0 }
 0x9a9   :  { %1793 = vpow2.f32 %v1149_v3 }
 0x9aa   :  { %1795 = vpow2.f32 %v1147_v4 }
 0x9b3   :  { %v1794_v5 = vpop.eup %1793 }
 0x9b4   :  { %v1796_v6 = vpop.eup %1795  ;;  %v1524_v7 = vadd.f32 -1.0, %v1794_v5 }
 0x9b5   :  { %v1523_v8 = vadd.f32 -1.0, %v1796_v6 }
 0x9b6   :  { %v1154_v10 = vsel %vm1146_vm7, %v1142_v0, %v1524_v7 }
 0x9b7   :  { %v1153_v9 = vsel %vm1145_vm5, %v1137_v2, %v1523_v8 }
 0x9b8   :  { %1650 = vmatprep.mubr.msk.f32.mxu1 %vm794_vm14, %v1153_v9 }
 0x9b9   :  { %1651 = vmatmul.mubr.msk.f32.vlgmr.msra.gmra.mrb[6].mxu1 %vm794_vm14, %v1154_v10 }
 0xa8c   :  { %v1652_v11 = vpop.f32.mrb[6].mxu1 }
 0xa8d   :  { %v1227_v12 = vpop.f32.mrb[7].mxu1 }
 0xa8e   :  { %v1707_v13 = vpack.c.bf16 %v1652_v11, %v1227_v12  ;;  %1657 = vmatprep.mubr.msk.f32.mxu0 %vm331_vm6, %v1227_v12 }
 0xa8f   :  { %1658 = vmatmul.mubr.msk.f32.vlgmr.msra.gmra.mrb[12].mxu0 %vm331_vm6, %v1652_v11 }
 0xa90   :  { %1708 = vmatprep.subr.bf16.mxu1 %v1707_v13 }
 0xa91   :  { %1710 = vmatpush3.bf16.msra.mxu1 %v1707_v13 }
 0xb62   :  { %v1659_v14 = vpop.f32.mrb[12].mxu0 }
 0xb63   :  { %1356 = vperm.xlu0 %1747, %v1659_v14   ;;  %v1308_v15 = vpop.f32.mrb[13].mxu0 }
 0xb67   :  { %1351 = vperm.xlu0 %1747, %v1308_v15  }
 0xb85   :  { %1317 = vxpose.xlu0.b32.start [1/2] (short) (narrow) %v1308_v15, 8 }
 0xb89   :  { %1318 = vxpose.xlu0.b32.end [2/2] (short) (narrow) %v1659_v14, 8 }
 0xbe2   :  { %v1357_v16 = vpop.permute.xlu0 %1356 }
 0xbe6   :  { %v1352_v17 = vpop.permute.xlu0 %1351 }
 0xc05   :  { %v1333_v18 = vpop.trf.xlu0 }
 0xc06   :  { %v1362_v19 = vrot.slane %v1333_v18, %v1887_v26 }
 0xc08   :  { %v1363_v20 = vadd.f32 %v1362_v19, %v1352_v17  ;;  %v1364_v21 = vadd.f32 %v1362_v19, %v1357_v16 }
 0xc0a   :  { %vm1365_vm8 = vcmp.ge.f32.partialorder %v1363_v20, 0.0  ;;  %v1367_v22 = vmul.f32 0.2, %v1363_v20  ;;  %vm1366_vm10 = vcmp.ge.f32.partialorder %v1364_v21, 0.0  ;;  %v1368_v23 = vmul.f32 0.2, %v1364_v21 }
 0xc0c   :  { %v1369_v24 = vsel %vm1365_vm8, %v1363_v20, %v1367_v22  ;;  %v1370_v25 = vsel %vm1366_vm10, %v1364_v21, %v1368_v23 }
 0xc0d   :  { %v1371_v27 = vsel %vm33_vm9, %v1369_v24, -1e+30  ;;  %v1372_v30 = vsel %vm34_vm3, %v1370_v25, -1e+30 }
 0xc0e   :  { %v1373_v28 = vsel %vm331_vm6, %v1371_v27, -inf  ;;  %v1376_v31 = vsel %vm331_vm6, %v1372_v30, -inf }
 0xc0f   :  { %1374 = vmax.xlane.f32.xlu1 %v1373_v28 }
 0xc13   :  { %1377 = vmax.xlane.f32.xlu1 %v1376_v31 }
 0xc9c   :  { %v1375_v26 = vpop.xlane.xlu1 %1374 }
 0xc9d   :  { %v1379_v32 = vsub.f32 %v1371_v27, %v1375_v26 }
 0xc9f   :  { %v1381_v35 = vmul.f32 1.442695, %v1379_v32 }
 0xca0   :  { %v1378_v36 = vpop.xlane.xlu1 %1377 }
 0xca1   :  { %1797 = vpow2.f32 %v1381_v35  ;;  %v1380_v38 = vsub.f32 %v1372_v30, %v1378_v36 }
 0xca3   :  { %v1383_v39 = vmul.f32 1.442695, %v1380_v38 }
 0xca5   :  { %1799 = vpow2.f32 %v1383_v39 }
 0xcab   :  { %v1798_v34 = vpop.eup %1797 }
 0xcac   :  { %v1385_v45 = vsel %vm331_vm6, %v1798_v34, 0.0 }
 0xcad   :  { %1386 = vadd.xlane.f32.xlu1 %v1385_v45 }
 0xcaf   :  { %v1800_v40 = vpop.eup %1799 }
 0xcb0   :  { %v1388_v42 = vsel %vm331_vm6, %v1800_v40, 0.0 }
 0xcb1   :  { %1389 = vadd.xlane.f32.xlu1 %v1388_v42 }
 0xd3a   :  { %v1387_v33 = vpop.xlane.xlu1 %1386 }
 0xd3b   :  { %v1391_v29 = vmax.f32 %v1387_v33, 1e-20 }
 0xd3d   :  { %1801 = vrcp.f32 %v1391_v29 }
 0xd3e   :  { %v1390_v43 = vpop.xlane.xlu1 %1389 }
 0xd3f   :  { %v1392_v37 = vmax.f32 %v1390_v43, 1e-20 }
 0xd41   :  { %1803 = vrcp.f32 %v1392_v37 }
 0xd47   :  { %v1802_v44 = vpop.eup %1801 }
 0xd48   :  { %v1395_v46 = vmul.f32 %v1802_v44, %v1798_v34 }
 0xd4a   :  { %1664 = vmatprep.mubr.msk.f32.mxu1 %vm331_vm6, %v1395_v46 }
 0xd4b   :  { %v1804_v47 = vpop.eup %1803 }
 0xd4c   :  { %v1396_v48 = vmul.f32 %v1804_v47, %v1800_v40 }
 0xd4e   :  { %1665 = vmatmul.mubr.msk.f32.vlgmr.msra.gmra.mrb[8].mxu1 %vm331_vm6, %v1396_v48 }
 0xe21   :  { %v1666_v50 = vpop.f32.mrb[8].mxu1 }
 0xe22   :  { %v1479_v51 = vadd.f32 %v1666_v50, %v1529_v49  ;;  %v1473_v41 = vpop.f32.mrb[9].mxu1 }
 0xe23   :  { %v1474_v52 = vadd.f32 %v1529_v49, %v1473_v41 }
 0xe24   :  { %1483 = vst.msk [vmem:[#allocation2 + $0x8] sm:$0xff] %vm331_vm6, %v1479_v51 }
 0xe25   :  { %1482 = vst.msk [vmem:[#allocation2] sm:$0xff] %vm331_vm6, %v1474_v52 }
 0xe26   :  { %1816 = shalt.err (!%p1813_p4)
}
 0xe27   :  { %s1817_s4 = scalar_lea.hbm %s2068_s3, 256 }
 0xe28   :  { %p1818_p5 = scmp.ne.s32.totalorder %s2068_s3, %s1817_s4  ;;  %p1821_p6 = scmp.lt.u32.totalorder %s1817_s4, %s2068_s3 }
 0xe2a   :  { %p1823_p7 = pnand %p1821_p6, %p1818_p5 }
 0xe2c   :  { %1826 = shalt.err (!%p1823_p7)
}
 0xe2d   :  { %s1841_s9 = smov 128  }
 0xe2e   :  { %1495 = dma.vmem_to_hbm [thread:$0]  %s1490_s1, 256, %s2068_s3, [#allocation3], %s1841_s9, %s1841_s9, %s1837_s13  }
 0xe2f   :  { %1827 = dma.done.wait [#allocation3], 256  }
 0xe30   :  { %1828 = vsyncadd [#allocation3], 4294967040 }
 0xe31   :  { %1499 = vsyncpa [#allocation3], 1 }

</bundles_post_ra>
